<compile_context>
chip_gen: v6e
topology: v6e:2x2x1
jax: 0.10.0
libtpu: 0.0.40
codegen_flags: <defaults>
</compile_context>

<pallas_src>
import functools

import jax
import jax.numpy as jnp
from jax import lax
from jax.experimental import pallas as pl
from jax.experimental.pallas import tpu as pltpu


def _affine_grid_sample_kernel(a_ref, x_ref, o_ref, *, H, W, TILE_O):
    """One grid step == one (batch, output-column-tile) pair."""
    b = pl.program_id(0)
    t = pl.program_id(1)
    rows_per_tile = TILE_O // W          # TILE_O is always a multiple of W

    # ---- affine parameters: scalar reads from the flat 1-D SMEM array -----
    base = b * 6
    a00 = a_ref[base + 0]
    a01 = a_ref[base + 1]
    a02 = a_ref[base + 2]
    a10 = a_ref[base + 3]
    a11 = a_ref[base + 4]
    a12 = a_ref[base + 5]

    fW = jnp.float32(W)
    fH = jnp.float32(H)

    # ---- output-pixel coordinates for this column tile, shape (1, TILE_O) --
    # The tile covers whole output rows (TILE_O % W == 0); o_local < TILE_O
    # is small, so the float floor-divide below is exact (no HW~4M hazard).
    o_local = lax.broadcasted_iota(jnp.int32, (1, TILE_O), 1).astype(jnp.float32)
    i_local = jnp.floor((o_local + 0.5) * (1.0 / W))
    j_out = o_local - i_local * fW
    row0 = (t * rows_per_tile).astype(jnp.float32)
    i_out = i_local + row0

    # F.affine_grid base grid (align_corners=False): pixel-center coords.
    xs = (2.0 * j_out + 1.0 - fW) / fW
    ys = (2.0 * i_out + 1.0 - fH) / fH
    gx = a00 * xs + a01 * ys + a02
    gy = a10 * xs + a11 * ys + a12

    # grid_sample un-normalization (align_corners=False).
    ix = ((gx + 1.0) * fW - 1.0) * 0.5
    iy = ((gy + 1.0) * fH - 1.0) * 0.5
    x0 = jnp.floor(ix)
    tx = ix - x0
    y0 = jnp.floor(iy)
    ty = iy - y0

    # ---- separable bilinear weight maps (small: (H,TILE_O) / (W,TILE_O)) ---
    # One-hot float equality against floor(iy)/floor(ix); out-of-range corners
    # match no row, which is exactly padding_mode='zeros'.
    p_iota = lax.broadcasted_iota(jnp.int32, (H, TILE_O), 0).astype(jnp.float32)
    q_iota = lax.broadcasted_iota(jnp.int32, (W, TILE_O), 0).astype(jnp.float32)
    wy = (jnp.where(p_iota == y0, 1.0 - ty, 0.0)
          + jnp.where(p_iota == y0 + 1.0, ty, 0.0))
    wx = (jnp.where(q_iota == x0, 1.0 - tx, 0.0)
          + jnp.where(q_iota == x0 + 1.0, tx, 0.0))

    # ---- sampling slab: ONE broadcast multiply + (layout-trivial) reshape --
    m_t = (wy[:, None, :] * wx[None, :, :]).reshape(H * W, TILE_O)

    # ---- single MXU matmul: (C, HW) @ (HW, TILE_O) -> (C, TILE_O) ----------
    res = jnp.dot(x_ref[...], m_t, preferred_element_type=jnp.float32)
    o_ref[...] = res.astype(o_ref.dtype)


def _pick_tile_o(H, W, slab_budget_bytes=8 << 20):
    """Pick TILE_O = r*W with r | H so the (HW, TILE_O) slab fits the budget
    and the block stays lane-dense (TILE_O % 128 == 0 unless it is full HW)."""
    HW = H * W
    if HW * HW * 4 <= slab_budget_bytes:
        return HW                       # single full tile (small images)
    max_cols = max(W, slab_budget_bytes // (HW * 4))
    cands = [r * W for r in range(1, H + 1)
             if H % r == 0 and r * W <= max_cols and (r * W) % 128 == 0]
    if cands:
        return max(cands)
    # TODO(synk): pad H*W / tile columns to multiples of 128 for awkward H, W.
    return HW


def affine_trans(x, A):
    """x: (B, C, H, W) float32, A: (B, 2, 3) float32 -> (B, C, H, W) float32."""
    B, C, H, W = x.shape
    HW = H * W
    TILE_O = _pick_tile_o(H, W)
    num_tiles = HW // TILE_O

    x_flat = x.reshape(B, C, HW).astype(jnp.float32)
    a_flat = A.reshape(B * 6).astype(jnp.float32)   # 1-D SMEM: minimal padding

    kernel = functools.partial(_affine_grid_sample_kernel,
                               H=H, W=W, TILE_O=TILE_O)

    out_flat = pl.pallas_call(
        kernel,
        out_shape=jax.ShapeDtypeStruct((B, C, HW), jnp.float32),
        grid=(B, num_tiles),
        in_specs=[
            # affine params -> SMEM, scalar reads in-kernel
            pl.BlockSpec(memory_space=pltpu.MemorySpace.SMEM),
            # per-batch activation block; constant index across o-tiles so it
            # stays resident in VMEM while o-tiles iterate
            pl.BlockSpec((None, C, HW), lambda b, t: (b, 0, 0)),
        ],
        out_specs=pl.BlockSpec((None, C, TILE_O), lambda b, t: (b, 0, t)),
        compiler_params=pltpu.CompilerParams(
            dimension_semantics=("parallel", "parallel"),
            vmem_limit_bytes=32 * 1024 * 1024),
    )(a_flat, x_flat)

    return out_flat.reshape(B, C, H, W)


def _reference_affine_trans(x, A):
    """Pure-JAX reference: F.affine_grid + bilinear grid_sample (zeros pad)."""
    B, C, H, W = x.shape
    js = (2.0 * jnp.arange(W, dtype=jnp.float32) + 1.0 - W) / W
    is_ = (2.0 * jnp.arange(H, dtype=jnp.float32) + 1.0 - H) / H
    ysg, xsg = jnp.meshgrid(is_, js, indexing="ij")            # (H, W)
    base = jnp.stack([xsg, ysg, jnp.ones_like(xsg)], axis=-1)  # (H, W, 3)
    grid = jnp.einsum("hwk,bnk->bhwn", base, A)                # (B, H, W, 2)
    gx, gy = grid[..., 0], grid[..., 1]
    ix = ((gx + 1.0) * W - 1.0) / 2.0
    iy = ((gy + 1.0) * H - 1.0) / 2.0
    x0 = jnp.floor(ix); x1 = x0 + 1.0
    y0 = jnp.floor(iy); y1 = y0 + 1.0

    bidx = jnp.arange(B)[:, None, None, None]
    cidx = jnp.arange(C)[None, :, None, None]

    def gather(yy, xx):
        yi = jnp.clip(yy, 0, H - 1).astype(jnp.int32)
        xi = jnp.clip(xx, 0, W - 1).astype(jnp.int32)
        valid = ((yy >= 0) & (yy <= H - 1) & (xx >= 0) & (xx <= W - 1))
        v = x[bidx, cidx, yi[:, None], xi[:, None]]
        return v * valid.astype(x.dtype)[:, None]

    w00 = ((x1 - ix) * (y1 - iy))[:, None]
    w01 = ((ix - x0) * (y1 - iy))[:, None]
    w10 = ((x1 - ix) * (iy - y0))[:, None]
    w11 = ((ix - x0) * (iy - y0))[:, None]
    return (gather(y0, x0) * w00 + gather(y0, x1) * w01 +
            gather(y1, x0) * w10 + gather(y1, x1) * w11)


if __name__ == "__main__":
    B, C, H, W = 2, 4, 16, 16

    key = jax.random.PRNGKey(0)
    kx, ka = jax.random.split(key)
    x = jax.random.normal(kx, (B, C, H, W), jnp.float32)

    # Affine matrices: per-batch rotation + scale + small translation.
    ang = jnp.array([0.2, -0.35], jnp.float32)
    cos, sin = jnp.cos(ang), jnp.sin(ang)
    scale = jnp.array([1.1, 0.9], jnp.float32)
    trans = 0.1 * jax.random.normal(ka, (B, 2), jnp.float32)
    A = jnp.stack([
        jnp.stack([scale * cos, -scale * sin, trans[:, 0]], axis=-1),
        jnp.stack([scale * sin,  scale * cos, trans[:, 1]], axis=-1),
    ], axis=1)                                                  # (B, 2, 3)

    out = jax.block_until_ready(affine_trans(x, A))
    assert out.shape == (B, C, H, W)

    ref = _reference_affine_trans(x, A)
    max_err = float(jnp.max(jnp.abs(out - ref)))
    assert jnp.allclose(out, ref, atol=1e-3, rtol=1e-3), max_err

    print("KERNEL_OK")
</pallas_src>

<mosaic_0001>
module attributes {stable_mosaic.version = 11 : i64} {
  func.func @_affine_grid_sample_kernel(%arg0: i32, %arg1: i32, %arg2: memref<12xf32, #tpu.memory_space<smem>>, %arg3: memref<1x4x256xf32, #tpu.memory_space<vmem>>, %arg4: memref<1x4x256xf32, #tpu.memory_space<vmem>>) attributes {dimension_semantics = [#tpu.dimension_semantics<parallel>, #tpu.dimension_semantics<parallel>], iteration_bounds = array<i64: 2, 1>, scalar_prefetch = 0 : i64, scratch_operands = 0 : i64, tpu.core_type = #tpu.core_type<tc>, window_params = [{transform_indices = @transform_0, window_bounds = array<i64: 12>}, {transform_indices = @transform_1, window_bounds = array<i64: 1, 4, 256>}, {transform_indices = @transform_2, window_bounds = array<i64: 1, 4, 256>}]} {
    %c6_i32 = arith.constant 6 : i32
    %0 = arith.muli %arg0, %c6_i32 : i32
    %c0_i32 = arith.constant 0 : i32
    %1 = arith.addi %0, %c0_i32 : i32
    %2 = arith.index_cast %1 : i32 to index
    %3 = memref.load %arg2[%2] : memref<12xf32, #tpu.memory_space<smem>>
    %c1_i32 = arith.constant 1 : i32
    %4 = arith.addi %0, %c1_i32 : i32
    %5 = arith.index_cast %4 : i32 to index
    %6 = memref.load %arg2[%5] : memref<12xf32, #tpu.memory_space<smem>>
    %c2_i32 = arith.constant 2 : i32
    %7 = arith.addi %0, %c2_i32 : i32
    %8 = arith.index_cast %7 : i32 to index
    %9 = memref.load %arg2[%8] : memref<12xf32, #tpu.memory_space<smem>>
    %c3_i32 = arith.constant 3 : i32
    %10 = arith.addi %0, %c3_i32 : i32
    %11 = arith.index_cast %10 : i32 to index
    %12 = memref.load %arg2[%11] : memref<12xf32, #tpu.memory_space<smem>>
    %c4_i32 = arith.constant 4 : i32
    %13 = arith.addi %0, %c4_i32 : i32
    %14 = arith.index_cast %13 : i32 to index
    %15 = memref.load %arg2[%14] : memref<12xf32, #tpu.memory_space<smem>>
    %c5_i32 = arith.constant 5 : i32
    %16 = arith.addi %0, %c5_i32 : i32
    %17 = arith.index_cast %16 : i32 to index
    %18 = memref.load %arg2[%17] : memref<12xf32, #tpu.memory_space<smem>>
    %19 = tpu.iota {dimensions = array<i32: 1>} : vector<1x256xi32>
    %20 = arith.sitofp %19 : vector<1x256xi32> to vector<1x256xf32>
    %cst = arith.constant 5.000000e-01 : f32
    %21 = vector.broadcast %cst : f32 to vector<1x256xf32>
    %22 = arith.addf %20, %21 : vector<1x256xf32>
    %cst_0 = arith.constant 6.250000e-02 : f32
    %23 = vector.broadcast %cst_0 : f32 to vector<1x256xf32>
    %24 = arith.mulf %22, %23 : vector<1x256xf32>
    %25 = math.floor %24 : vector<1x256xf32>
    %cst_1 = arith.constant 1.600000e+01 : f32
    %26 = vector.broadcast %cst_1 : f32 to vector<1x256xf32>
    %27 = arith.mulf %25, %26 : vector<1x256xf32>
    %28 = arith.subf %20, %27 : vector<1x256xf32>
    %c16_i32 = arith.constant 16 : i32
    %29 = arith.muli %arg1, %c16_i32 : i32
    %30 = arith.sitofp %29 : i32 to f32
    %31 = vector.broadcast %30 : f32 to vector<1x256xf32>
    %32 = arith.addf %25, %31 : vector<1x256xf32>
    %cst_2 = arith.constant 2.000000e+00 : f32
    %33 = vector.broadcast %cst_2 : f32 to vector<1x256xf32>
    %34 = arith.mulf %33, %28 : vector<1x256xf32>
    %cst_3 = arith.constant 1.000000e+00 : f32
    %35 = vector.broadcast %cst_3 : f32 to vector<1x256xf32>
    %36 = arith.addf %34, %35 : vector<1x256xf32>
    %cst_4 = arith.constant 1.600000e+01 : f32
    %37 = vector.broadcast %cst_4 : f32 to vector<1x256xf32>
    %38 = arith.subf %36, %37 : vector<1x256xf32>
    %cst_5 = arith.constant 1.600000e+01 : f32
    %39 = vector.broadcast %cst_5 : f32 to vector<1x256xf32>
    %40 = arith.divf %38, %39 : vector<1x256xf32>
    %cst_6 = arith.constant 2.000000e+00 : f32
    %41 = vector.broadcast %cst_6 : f32 to vector<1x256xf32>
    %42 = arith.mulf %41, %32 : vector<1x256xf32>
    %cst_7 = arith.constant 1.000000e+00 : f32
    %43 = vector.broadcast %cst_7 : f32 to vector<1x256xf32>
    %44 = arith.addf %42, %43 : vector<1x256xf32>
    %cst_8 = arith.constant 1.600000e+01 : f32
    %45 = vector.broadcast %cst_8 : f32 to vector<1x256xf32>
    %46 = arith.subf %44, %45 : vector<1x256xf32>
    %cst_9 = arith.constant 1.600000e+01 : f32
    %47 = vector.broadcast %cst_9 : f32 to vector<1x256xf32>
    %48 = arith.divf %46, %47 : vector<1x256xf32>
    %49 = vector.broadcast %3 : f32 to vector<1x256xf32>
    %50 = arith.mulf %49, %40 : vector<1x256xf32>
    %51 = vector.broadcast %6 : f32 to vector<1x256xf32>
    %52 = arith.mulf %51, %48 : vector<1x256xf32>
    %53 = arith.addf %50, %52 : vector<1x256xf32>
    %54 = vector.broadcast %9 : f32 to vector<1x256xf32>
    %55 = arith.addf %53, %54 : vector<1x256xf32>
    %56 = vector.broadcast %12 : f32 to vector<1x256xf32>
    %57 = arith.mulf %56, %40 : vector<1x256xf32>
    %58 = vector.broadcast %15 : f32 to vector<1x256xf32>
    %59 = arith.mulf %58, %48 : vector<1x256xf32>
    %60 = arith.addf %57, %59 : vector<1x256xf32>
    %61 = vector.broadcast %18 : f32 to vector<1x256xf32>
    %62 = arith.addf %60, %61 : vector<1x256xf32>
    %cst_10 = arith.constant 1.000000e+00 : f32
    %63 = vector.broadcast %cst_10 : f32 to vector<1x256xf32>
    %64 = arith.addf %55, %63 : vector<1x256xf32>
    %cst_11 = arith.constant 1.600000e+01 : f32
    %65 = vector.broadcast %cst_11 : f32 to vector<1x256xf32>
    %66 = arith.mulf %64, %65 : vector<1x256xf32>
    %cst_12 = arith.constant 1.000000e+00 : f32
    %67 = vector.broadcast %cst_12 : f32 to vector<1x256xf32>
    %68 = arith.subf %66, %67 : vector<1x256xf32>
    %cst_13 = arith.constant 5.000000e-01 : f32
    %69 = vector.broadcast %cst_13 : f32 to vector<1x256xf32>
    %70 = arith.mulf %68, %69 : vector<1x256xf32>
    %cst_14 = arith.constant 1.000000e+00 : f32
    %71 = vector.broadcast %cst_14 : f32 to vector<1x256xf32>
    %72 = arith.addf %62, %71 : vector<1x256xf32>
    %cst_15 = arith.constant 1.600000e+01 : f32
    %73 = vector.broadcast %cst_15 : f32 to vector<1x256xf32>
    %74 = arith.mulf %72, %73 : vector<1x256xf32>
    %cst_16 = arith.constant 1.000000e+00 : f32
    %75 = vector.broadcast %cst_16 : f32 to vector<1x256xf32>
    %76 = arith.subf %74, %75 : vector<1x256xf32>
    %cst_17 = arith.constant 5.000000e-01 : f32
    %77 = vector.broadcast %cst_17 : f32 to vector<1x256xf32>
    %78 = arith.mulf %76, %77 : vector<1x256xf32>
    %79 = math.floor %70 : vector<1x256xf32>
    %80 = arith.subf %70, %79 : vector<1x256xf32>
    %81 = math.floor %78 : vector<1x256xf32>
    %82 = arith.subf %78, %81 : vector<1x256xf32>
    %83 = tpu.iota {dimensions = array<i32: 0>} : vector<16x256xi32>
    %84 = arith.sitofp %83 : vector<16x256xi32> to vector<16x256xf32>
    %85 = tpu.iota {dimensions = array<i32: 0>} : vector<16x256xi32>
    %86 = arith.sitofp %85 : vector<16x256xi32> to vector<16x256xf32>
    %87 = vector.broadcast %81 : vector<1x256xf32> to vector<16x256xf32>
    %88 = arith.cmpf oeq, %84, %87 : vector<16x256xf32>
    %cst_18 = arith.constant 1.000000e+00 : f32
    %89 = vector.broadcast %cst_18 : f32 to vector<1x256xf32>
    %90 = arith.subf %89, %82 : vector<1x256xf32>
    %cst_19 = arith.constant 0.000000e+00 : f32
    %91 = vector.shape_cast %90 : vector<1x256xf32> to vector<1x256xf32>
    %92 = vector.broadcast %91 : vector<1x256xf32> to vector<16x256xf32>
    %93 = vector.broadcast %cst_19 : f32 to vector<16x256xf32>
    %94 = arith.select %88, %92, %93 : vector<16x256xi1>, vector<16x256xf32>
    %cst_20 = arith.constant 1.000000e+00 : f32
    %95 = vector.broadcast %cst_20 : f32 to vector<1x256xf32>
    %96 = arith.addf %81, %95 : vector<1x256xf32>
    %97 = vector.broadcast %96 : vector<1x256xf32> to vector<16x256xf32>
    %98 = arith.cmpf oeq, %84, %97 : vector<16x256xf32>
    %cst_21 = arith.constant 0.000000e+00 : f32
    %99 = vector.shape_cast %82 : vector<1x256xf32> to vector<1x256xf32>
    %100 = vector.broadcast %99 : vector<1x256xf32> to vector<16x256xf32>
    %101 = vector.broadcast %cst_21 : f32 to vector<16x256xf32>
    %102 = arith.select %98, %100, %101 : vector<16x256xi1>, vector<16x256xf32>
    %103 = arith.addf %94, %102 : vector<16x256xf32>
    %104 = vector.broadcast %79 : vector<1x256xf32> to vector<16x256xf32>
    %105 = arith.cmpf oeq, %86, %104 : vector<16x256xf32>
    %cst_22 = arith.constant 1.000000e+00 : f32
    %106 = vector.broadcast %cst_22 : f32 to vector<1x256xf32>
    %107 = arith.subf %106, %80 : vector<1x256xf32>
    %cst_23 = arith.constant 0.000000e+00 : f32
    %108 = vector.shape_cast %107 : vector<1x256xf32> to vector<1x256xf32>
    %109 = vector.broadcast %108 : vector<1x256xf32> to vector<16x256xf32>
    %110 = vector.broadcast %cst_23 : f32 to vector<16x256xf32>
    %111 = arith.select %105, %109, %110 : vector<16x256xi1>, vector<16x256xf32>
    %cst_24 = arith.constant 1.000000e+00 : f32
    %112 = vector.broadcast %cst_24 : f32 to vector<1x256xf32>
    %113 = arith.addf %79, %112 : vector<1x256xf32>
    %114 = vector.broadcast %113 : vector<1x256xf32> to vector<16x256xf32>
    %115 = arith.cmpf oeq, %86, %114 : vector<16x256xf32>
    %cst_25 = arith.constant 0.000000e+00 : f32
    %116 = vector.shape_cast %80 : vector<1x256xf32> to vector<1x256xf32>
    %117 = vector.broadcast %116 : vector<1x256xf32> to vector<16x256xf32>
    %118 = vector.broadcast %cst_25 : f32 to vector<16x256xf32>
    %119 = arith.select %115, %117, %118 : vector<16x256xi1>, vector<16x256xf32>
    %120 = arith.addf %111, %119 : vector<16x256xf32>
    %121 = vector.shape_cast %103 : vector<16x256xf32> to vector<16x1x256xf32>
    %122 = vector.shape_cast %120 : vector<16x256xf32> to vector<1x16x256xf32>
    %123 = vector.broadcast %121 : vector<16x1x256xf32> to vector<16x16x256xf32>
    %124 = vector.broadcast %122 : vector<1x16x256xf32> to vector<16x16x256xf32>
    %125 = arith.mulf %123, %124 : vector<16x16x256xf32>
    %126 = vector.shape_cast %125 : vector<16x16x256xf32> to vector<256x256xf32>
    %c0 = arith.constant 0 : index
    %c0_26 = arith.constant 0 : index
    %c0_27 = arith.constant 0 : index
    %127 = vector.load %arg3[%c0, %c0_26, %c0_27] : memref<1x4x256xf32, #tpu.memory_space<vmem>>, vector<1x4x256xf32>
    %128 = vector.shape_cast %127 : vector<1x4x256xf32> to vector<4x256xf32>
    %cst_28 = arith.constant dense<0.000000e+00> : vector<4x256xf32>
    %129 = tpu.matmul %128, %126, %cst_28 {dimension_numbers = #tpu.dot_dimension_numbers<[1], [0], [0], [1], [0, 0, 1, 1], [], []>} : vector<4x256xf32>, vector<256x256xf32>, vector<4x256xf32> -> vector<4x256xf32>
    %c0_29 = arith.constant 0 : index
    %c0_30 = arith.constant 0 : index
    %c0_31 = arith.constant 0 : index
    %130 = vector.load %arg4[%c0_29, %c0_30, %c0_31] : memref<1x4x256xf32, #tpu.memory_space<vmem>>, vector<1x4x256xf32>
    %131 = vector.shape_cast %130 : vector<1x4x256xf32> to vector<4x256xf32>
    %132 = vector.shape_cast %129 : vector<4x256xf32> to vector<1x4x256xf32>
    tpu.vector_store %arg4[%c0_29, %c0_30, %c0_31], %132 {strides = array<i32>} : memref<1x4x256xf32, #tpu.memory_space<vmem>>, vector<1x4x256xf32>,
    return
  }
  func.func @transform_0(%arg0: i32, %arg1: i32) -> i32 {
    %c0_i32 = arith.constant 0 : i32
    %c0_i32_0 = arith.constant 0 : i32
    return %c0_i32 : i32
  }
  func.func @transform_1(%arg0: i32, %arg1: i32) -> (i32, i32, i32) {
    %c0_i32 = arith.constant 0 : i32
    %c0_i32_0 = arith.constant 0 : i32
    %c0_i32_1 = arith.constant 0 : i32
    return %arg0, %c0_i32, %c0_i32_0 : i32, i32, i32
  }
  func.func @transform_2(%arg0: i32, %arg1: i32) -> (i32, i32, i32) {
    %c0_i32 = arith.constant 0 : i32
    %c0_i32_0 = arith.constant 0 : i32
    return %arg0, %c0_i32, %arg1 : i32, i32, i32
  }
}

</mosaic_0001>

<bundles_post_ra>
// kernel: tpu_custom_call.1
= control target key start
LH: loop header
LB: loop body
LE: loop exit
PB: predicated region body
PF: predicated region fallthrough
CT: control target
= control target key end

     0   :  { %7 = vsyncpa [#allocation5], 0  ;;  %s1456_s0 = inlined_call_operand.hbm [shape: f32[12], index: 0, kind: input, shape index: {}]   ;;  %s1457_s1 = inlined_call_operand.hbm [shape: f32[2,4,256], index: 1, kind: input, shape index: {}]   ;;  %s1458_s2 = inlined_call_operand.hbm [shape: f32[2,4,256], index: 2, kind: output, shape index: {}]  }
   0x1   :  { %8 = vsyncpa [#allocation3], 0 }
   0x2   :  { %10 = vsyncpa [#allocation3 + $0x1], 0 }
   0x3   :  { %11 = vsyncpa [#allocation4], 0 }
   0x4   :  { %13 = vsyncpa [#allocation4 + $0x1], 0  ;;  %s1099_s9 = smov 0   ;;  %s1101_s10 = smov 0  }
   0x5   :  { %s1103_s11 = smov 0   ;;  %s1105_s12 = smov 0  }
   0x6   :  { %s1107_s13 = smov 0   ;;  %s1109_s14 = smov 0  }
   0x7 LB: > { %s853_s15 = sadd.s32 4294967295, %s1078_s14   ;;  %s854_s16 = sadd.s32 4294967294, %s1078_s14   ;;  %s1078_s14 = sphi %s1109_s14, %s19_s14   ;;  %s1074_s13 = sphi %s1107_s13, %s1475_s13   ;;  %s1070_s12 = sphi %s1105_s12, %s1474_s12   ;;  %s1066_s11 = sphi %s1103_s11, %s1473_s11   ;;  %s1062_s10 = sphi %s1101_s10, %s1472_s10   ;;  %s1058_s9 = sphi %s1099_s9, %s1471_s9  }
   0x8   : > { %p72_p0 = scmp.ne.s32.totalorder %s1062_s10, %s1058_s9  ;;  %p1133_p1 = scmp.eq.s32.totalorder %s853_s15, 0 }
   0x9   : > { %p1137_p2 = scmp.eq.s32.totalorder %s853_s15, 1  ;;  %p104_p3 = scmp.eq.s32.totalorder %s854_s16, 1 }
   0xa   : > { %p1143_p4 = por %p1133_p1, %p72_p0  ;;  %p855_p5 = scmp.ge.s32.totalorder %s1078_s14, 1 }
   0xb   : > { %p1148_p6 = por %p104_p3, %p72_p0  ;;  %p111_p7 = scmp.lt.s32.totalorder %s1078_s14, 3 }
   0xc   : > { %s31_s22 = sadd.s32 1, %s1074_s13  ;;  %s59_s23 = sadd.s32 1, %s1066_s11 }
   0xd   : > { %s1463_s20 = scalar_select %p1148_p6, 1, 0 }
   0xe   : > { %p1153_p8 = pnand %p855_p5, %p111_p7  ;;  %p33_p12 = scmp.ge.s32.totalorder %s31_s22, 2 }
   0xf   : > { %p66_p13 = scmp.ne.s32.totalorder %s1066_s11, %s1062_s10  ;;  %p67_p0 = scmp.eq.s32.totalorder %s1078_s14, 0 }
  0x10   : > { %p888_p10 = pneg %p1153_p8  ;;  %s1080_s24 = smov [#allocation2]  }
  0x11   : > { %s1477_s22 = smov (%p33_p12, %s31_s22), 0  ;;  %p1172_p3 = por %p67_p0, %p66_p13 }
  0x12   : > { %p889_p11 = pnand %p888_p10, %p1133_p1  ;;  %p1178_p5 = por %p1137_p2, %p66_p13 }
  0x13   : > { %s56_s29 = ssub.s32 %s1074_s13, %s1477_s22  ;;  %p901_p7 = scmp.lt.s32.totalorder %s1078_s14, 2 }
  0x14   : > { %891 = dma.hbm_to_smem (!%p889_p11), %s1456_s0, 16, %s1080_s24, [#allocation5]  }
  0x15   : > { %s1466_s28 = scalar_select %p1178_p5, 1, 0 }
  0x16   : > { %p57_p10 = scmp.eq.s32.totalorder %s56_s29, 0  ;;  %s133_s30 = sand.u32 1, %s1066_s11  }
  0x17   : > { %s858_s3 = sshll.u32 %s133_s30, 3  ;;  %s878_s5 = sshll.u32 %s1074_s13, 7 }
  0x18   : > { %s1187_s4 = scalar_select %p57_p10, %s1066_s11, %s59_s23  }
  0x19   : > { %s143_s8 = scalar_lea.hbm %s1457_s1, %s878_s5  ;;  %s137_s15 = scalar_lea.vmem [#allocation6], %s858_s3 }
  0x1a   : > { %s145_s16 = sshll.u32 %s137_s15, 4  ;;  %p1195_p2 = pnand %p901_p7, %p1172_p3  ;;  %s146_s16 = int_to_ptr.vmem [resolvable:$true] %s145_s16 }
  0x1b   : > { %s134_s24 = scalar_lea.sflag [#allocation3], %s133_s30  ;;  %s979_s25 = scalar_lea.vmem %s146_s16, 128 }
  0x1c   : > { %p968_p11 = pneg %p1195_p2  ;;  %p980_p12 = scmp.ne.s32.totalorder %s146_s16, %s979_s25 }
  0x1d   : > { %s1081_s23 = smov [#allocation6]  }
  0x1e   : > { %p982_p13 = pnand %p980_p12, %p968_p11  ;;  %s984_s26 = sshll.u32 %s1081_s23, 4  ;;  %s985_s26 = int_to_ptr.vmem [resolvable:$false] %s984_s26 }
  0x1f   : > { %s986_s29 = scalar_lea.vmem %s985_s26, 256  ;;  %p987_p10 = scmp.lt.s32.totalorder %s146_s16, %s985_s26 }
  0x20   : > { %p983_p0 = pneg %p982_p13  ;;  %p988_p9 = scmp.lt.s32.totalorder %s986_s29, %s979_s25 }
  0x22   : > { %p989_p6 = por %p988_p9, %p987_p10 }
  0x24   : > { %p990_p5 = pnand %p989_p6, %p983_p0 }
  0x26   : > { %993 = shalt.err (!%p990_p5)
}
  0x27   : > { %895 = dma.hbm_to_vmem [thread:$0]  (!%p1195_p2), %s143_s8, 128, %s146_s16, %s134_s24  }
  0x28   : > { %154 = sbr.rel (%p1153_p8) target bundleno = 389 (0x185), region = 28 }
  0x2d   : > { %1045 = dma.done.wait (%p1133_p1), [#allocation5], 16  }
  0x2e   : > { %1047 = vsyncadd (%p1133_p1), [#allocation5], 4294967280  ;;  %s1210_s27 = sand.u32 1, %s1062_s10  }
  0x2f   : > { %s863_s30 = sshll.u32 %s1210_s27, 3  ;;  %s161_s3 = scalar_lea.sflag [#allocation3], %s1210_s27 }
  0x30   : > { %s164_s5 = scalar_lea.vmem [#allocation6], %s863_s30 }
  0x31   : > { %1049 = dma.done.wait (%p1143_p4), %s161_s3, 128  }
  0x32   : > { %1051 = vsyncadd (%p1143_p4), %s161_s3, 4294967168 }
  0x33   : > { %169 = sfence }
  0x34   : > { %v199_v0 = vlaneseq  ;;  %v1220_v1 = vld [vmem:[%s164_s5] sm:$0xff]  ;;  %s1226_s17 = smul.u32 6, %s1070_s12  ;;  %s879_s26 = sshll.u32 %s1070_s12, 7 }
  0x35   : > { %v665_v2 = vcombine.high %v1220_v1, %v1220_v1  ;;  %s185_s29 = scalar_lea.vmem [#allocation7], %s863_s30  ;;  %p1468_p4 = scmp.ne.s32.totalorder %s1466_s28, 0 }
  0x36   : > { %v200_v3 = vand.u32 127, %v199_v0  ;;  %s189_s19 = sadd.s32 1, %s1226_s17  ;;  %s195_s21 = sadd.s32 4, %s1226_s17  ;;  %v283_v61 = vshrl.u32 %v199_v0, 7 }
  0x37   : > { %731 = vmatprep.mubr.f32.mxu0 %v665_v2  ;;  %s1230_s6 = sld [smem:[#allocation2 + %s189_s19]]  ;;  %s193_s7 = sadd.s32 3, %s1226_s17 }
  0x38   : > { %v201_v4 = vadd.s32 128, %v200_v3  ;;  %v202_v5 = vcvt.s32.f32 %v200_v3  ;;  %s1233_s8 = sld [smem:[#allocation2 + %s195_s21]]  ;;  %s191_s16 = sadd.s32 2, %s1226_s17 }
  0x39   : > { %s1236_s15 = sld [smem:[#allocation2 + %s1226_s17]]  ;;  %s197_s24 = sadd.s32 5, %s1226_s17 }
  0x3a   : > { %v203_v6 = vcvt.s32.f32 %v201_v4  ;;  %v204_v7 = vadd.f32 0.5, %v202_v5  ;;  %s1239_s18 = sld [smem:[#allocation2 + %s193_s7]]  ;;  %s760_s3 = sshll.u32 %s185_s29, 4  ;;  %s761_s3 = int_to_ptr.vmem [resolvable:$true] %s760_s3 }
  0x3b   : > { %s1242_s25 = sld [smem:[#allocation2 + %s191_s16]]  ;;  %s758_s19 = scalar_lea.hbm %s1458_s2, %s879_s26 }
  0x3c   : > { %v205_v8 = vadd.f32 0.5, %v203_v6  ;;  %v206_v9 = vmul.f32 0.0625, %v204_v7  ;;  %s1244_s23 = sld [smem:[#allocation2 + %s197_s24]]  ;;  %v285_v7 = vcvt.s32.f32 %v283_v61  ;;  %s744_s21 = scalar_lea.sflag [#allocation4], %s1210_s27 }
  0x3d   : > { %v239_v27 = vstv %s1230_s6  ;;  %s994_s6 = scalar_lea.vmem %s761_s3, 128  ;;  %s1083_s7 = smov [#allocation7]  }
  0x3e   : > { %v207_v10 = vmul.f32 0.0625, %v205_v8  ;;  %v208_v11 = vfloor.f32 %v206_v9  ;;  %v250_v28 = vstv %s1233_s8  ;;  %p995_p1 = scmp.ne.s32.totalorder %s761_s3, %s994_s6  ;;  %s998_s8 = sshll.u32 %s1083_s7, 4  ;;  %s999_s8 = int_to_ptr.vmem [resolvable:$false] %s998_s8 }
  0x3f   : > { %v236_v32 = vstv %s1236_s15  ;;  %s1000_s12 = scalar_lea.vmem %s999_s8, 256  ;;  %p1001_p9 = scmp.lt.s32.totalorder %s761_s3, %s999_s8 }
  0x40   : > { %v209_v12 = vfloor.f32 %v207_v10  ;;  %v210_v13 = vmul.f32 16.0, %v208_v11  ;;  %v228_v14 = vmul.f32 2.0, %v208_v11  ;;  %v247_v33 = vstv %s1239_s18  ;;  %p996_p6 = pnand %p995_p1, %p1468_p4  ;;  %p1002_p3 = scmp.lt.s32.totalorder %s1000_s12, %s994_s6 }
  0x41   : > { %v244_v43 = vstv %s1242_s25 }
  0x42   : > { %v211_v15 = vmul.f32 16.0, %v209_v12  ;;  %v212_v16 = vsub.f32 %v202_v5, %v210_v13  ;;  %v229_v17 = vmul.f32 2.0, %v209_v12  ;;  %v230_v18 = vadd.f32 1.0, %v228_v14  ;;  %p997_p8 = pneg %p996_p6  ;;  %p1003_p5 = por %p1002_p3, %p1001_p9 }
  0x43   : > { %v255_v44 = vstv %s1244_s23  ;;  %v1082_v14 = vmov 1966171168  }
  0x44   : > { %v213_v19 = vsub.f32 %v203_v6, %v211_v15  ;;  %v219_v20 = vmul.f32 2.0, %v212_v16  ;;  %v231_v21 = vadd.f32 1.0, %v229_v17  ;;  %v867_v22 = vadd.f32 -16.0, %v230_v18  ;;  %p1004_p7 = pnand %p1003_p5, %p997_p8 }
  0x45   : > { %v342_v15 = vunpack.c.l.s4 %v1082_v14  ;;  %v284_v18 = vadd.s32 8, %v283_v61 }
  0x46   : > { %v220_v23 = vmul.f32 2.0, %v213_v19  ;;  %v221_v24 = vadd.f32 1.0, %v219_v20  ;;  %v868_v25 = vadd.f32 -16.0, %v231_v21  ;;  %v234_v26 = vmul.f32 0.0625, %v867_v22 }
  0x48   : > { %v222_v29 = vadd.f32 1.0, %v220_v23  ;;  %v865_v30 = vadd.f32 -16.0, %v221_v24  ;;  %v235_v31 = vmul.f32 0.0625, %v868_v25  ;;  %v240_v36 = vmul.f32 %v239_v27, %v234_v26 }
  0x49   : > { %v251_v37 = vmul.f32 %v250_v28, %v234_v26  ;;  %v343_v25 = vunpack.c.0.s8 %v342_v15 }
  0x4a   : > { %v866_v34 = vadd.f32 -16.0, %v222_v29  ;;  %v226_v35 = vmul.f32 0.0625, %v865_v30  ;;  %v241_v38 = vmul.f32 %v239_v27, %v235_v31  ;;  %v252_v42 = vmul.f32 %v250_v28, %v235_v31 }
  0x4b   : > { %v286_v30 = vcvt.s32.f32 %v284_v18 }
  0x4c   : > { %v227_v39 = vmul.f32 0.0625, %v866_v34  ;;  %v237_v40 = vmul.f32 %v236_v32, %v226_v35  ;;  %v248_v41 = vmul.f32 %v247_v33, %v226_v35  ;;  %v1277_v35 = vsub.s32 %v343_v25, %v283_v61 }
  0x4e   : > { %v238_v45 = vmul.f32 %v236_v32, %v227_v39  ;;  %v242_v46 = vadd.f32 %v240_v36, %v237_v40  ;;  %v249_v47 = vmul.f32 %v247_v33, %v227_v39  ;;  %v253_v48 = vadd.f32 %v251_v37, %v248_v41 }
  0x4f   : > { %v1279_v39 = vsub.s32 0, %v283_v61 }
  0x50   : > { %v243_v49 = vadd.f32 %v241_v38, %v238_v45  ;;  %v245_v50 = vadd.f32 %v244_v43, %v242_v46  ;;  %v254_v51 = vadd.f32 %v252_v42, %v249_v47  ;;  %v256_v52 = vadd.f32 %v255_v44, %v253_v48 }
  0x51   : > { %v1282_v45 = vsub.s32 1, %v283_v61 }
  0x52   : > { %v246_v53 = vadd.f32 %v244_v43, %v243_v49  ;;  %v257_v54 = vadd.f32 %v255_v44, %v254_v51  ;;  %v258_v55 = vadd.f32 1.0, %v245_v50  ;;  %v266_v56 = vadd.f32 1.0, %v256_v52 }
  0x54   : > { %v259_v57 = vadd.f32 1.0, %v246_v53  ;;  %v260_v58 = vmul.f32 16.0, %v258_v55  ;;  %v267_v59 = vadd.f32 1.0, %v257_v54  ;;  %v268_v60 = vmul.f32 16.0, %v266_v56 }
  0x56   : > { %v261_v62 = vmul.f32 16.0, %v259_v57  ;;  %v869_v63 = vadd.f32 -1.0, %v260_v58  ;;  %v269_v2 = vmul.f32 16.0, %v267_v59  ;;  %v871_v3 = vadd.f32 -1.0, %v268_v60 }
  0x58   : > { %v870_v4 = vadd.f32 -1.0, %v261_v62  ;;  %v872_v5 = vadd.f32 -1.0, %v269_v2  ;;  %v272_v6 = vmul.f32 0.5, %v871_v3  ;;  %v264_v8 = vmul.f32 0.5, %v869_v63 }
  0x5a   : > { %v273_v9 = vmul.f32 0.5, %v872_v5  ;;  %v1253_v10 = vfloor.f32 %v272_v6  ;;  %v265_v11 = vmul.f32 0.5, %v870_v4  ;;  %v274_v16 = vfloor.f32 %v264_v8 }
  0x5c   : > { %v1255_v12 = vfloor.f32 %v273_v9  ;;  %v1258_v13 = vsub.f32 %v272_v6, %v1253_v10  ;;  %vm287_vm0 = vcmp.eq.f32.partialorder %v285_v7, %v1253_v10  ;;  %v1262_v0 = vadd.f32 1.0, %v1253_v10 }
  0x5d   : > { %v275_v20 = vfloor.f32 %v265_v11  ;;  %v276_v26 = vsub.f32 %v264_v8, %v274_v16  ;;  %v321_v33 = vadd.f32 1.0, %v274_v16  ;;  %vm311_vm4 = vcmp.eq.f32.partialorder %v285_v7, %v274_v16 }
  0x5e   : > { %v1265_v17 = vsub.f32 %v273_v9, %v1255_v12  ;;  %v291_v19 = vsub.f32 1.0, %v1258_v13  ;;  %vm288_vm1 = vcmp.eq.f32.partialorder %v285_v7, %v1255_v12  ;;  %v1270_v21 = vadd.f32 1.0, %v1255_v12 }
  0x5f   : > { %vm299_vm2 = vcmp.eq.f32.partialorder %v285_v7, %v1262_v0  ;;  %v277_v29 = vsub.f32 %v265_v11, %v275_v20  ;;  %v322_v34 = vadd.f32 1.0, %v275_v20  ;;  %v315_v36 = vsub.f32 1.0, %v276_v26 }
  0x60   : > { %v292_v22 = vsub.f32 1.0, %v1265_v17  ;;  %v293_v23 = vsel %vm287_vm0, %v291_v19, 0.0  ;;  %v303_v24 = vsel %vm299_vm2, %v1258_v13, 0.0  ;;  %vm300_vm3 = vcmp.eq.f32.partialorder %v285_v7, %v1270_v21 }
  0x61   : > { %v304_v28 = vsel %vm300_vm3, %v1265_v17, 0.0  ;;  %v307_v31 = vadd.f32 %v303_v24, %v293_v23  ;;  %vm312_vm5 = vcmp.eq.f32.partialorder %v285_v7, %v275_v20  ;;  %vm313_vm6 = vcmp.eq.f32.partialorder %v286_v30, %v274_v16 }
  0x62   : > { %v294_v27 = vsel %vm288_vm1, %v292_v22, 0.0  ;;  %v316_v37 = vsub.f32 1.0, %v277_v29  ;;  %vm314_vm7 = vcmp.eq.f32.partialorder %v286_v30, %v275_v20  ;;  %vm323_vm8 = vcmp.eq.f32.partialorder %v285_v7, %v321_v33 }
  0x63   : > { %v308_v32 = vadd.f32 %v304_v28, %v294_v27  ;;  %vm325_vm9 = vcmp.eq.f32.partialorder %v286_v30, %v321_v33  ;;  %vm324_vm10 = vcmp.eq.f32.partialorder %v285_v7, %v322_v34  ;;  %vm326_vm11 = vcmp.eq.f32.partialorder %v286_v30, %v322_v34 }
  0x64   : > { %v317_v42 = vsel %vm311_vm4, %v315_v36, 0.0  ;;  %v318_v43 = vsel %vm312_vm5, %v316_v37, 0.0  ;;  %v319_v44 = vsel %vm313_vm6, %v315_v36, 0.0  ;;  %v320_v46 = vsel %vm314_vm7, %v316_v37, 0.0 }
  0x65   : > { %v340_v38 = vcombine.high %v307_v31, %v308_v32  ;;  %v339_v41 = vcombine.low %v307_v31, %v308_v32  ;;  %v329_v47 = vsel %vm325_vm9, %v276_v26, 0.0  ;;  %v327_v50 = vsel %vm323_vm8, %v276_v26, 0.0 }
  0x66   : > { %v328_v51 = vsel %vm324_vm10, %v277_v29, 0.0  ;;  %v330_v52 = vsel %vm326_vm11, %v277_v29, 0.0  ;;  %vm289_vm12 = vcmp.eq.f32.partialorder %v286_v30, %v1253_v10  ;;  %vm301_vm13 = vcmp.eq.f32.partialorder %v286_v30, %v1262_v0 }
  0x67   : > { %v354_v40 = vrot.slane %v340_v38, %v1277_v35  ;;  %v347_v55 = vrot.slane %v339_v41, %v1277_v35  ;;  %v1289_v56 = vadd.f32 %v329_v47, %v319_v44  ;;  %vm290_vm14 = vcmp.eq.f32.partialorder %v286_v30, %v1255_v12 }
  0x68   : > { %v1292_v57 = vadd.f32 %v328_v51, %v318_v43  ;;  %v1294_v58 = vadd.f32 %v330_v52, %v320_v46  ;;  %vm302_vm15 = vcmp.eq.f32.partialorder %v286_v30, %v1270_v21  ;;  %v1297_v60 = vadd.f32 %v327_v50, %v317_v42 }
  0x69   : > { %v356_v48 = vcombine.high %v354_v40, %v354_v40  ;;  %v370_v49 = vrot.slane %v354_v40, %v1277_v35  ;;  %v295_v61 = vsel %vm289_vm12, %v291_v19, 0.0  ;;  %v305_v62 = vsel %vm301_vm13, %v1258_v13, 0.0 }
  0x6a   : > { %v355_v4 = vcombine.high %v347_v55, %v347_v55  ;;  %v296_v6 = vsel %vm290_vm14, %v292_v22, 0.0  ;;  %v306_v7 = vsel %vm302_vm15, %v1265_v17, 0.0  ;;  %v1309_v12 = vadd.f32 %v305_v62, %v295_v61 }
  0x6b   : > { %v384_v53 = vrot.slane %v356_v48, %v1277_v35  ;;  %v386_v54 = vcombine.high %v370_v49, %v370_v49  ;;  %v1314_v15 = vadd.f32 %v306_v7, %v296_v6  ;;  %v363_v20 = vrot.slane %v347_v55, %v1277_v35 }
  0x6c   : > { %v377_v14 = vrot.slane %v355_v4, %v1277_v35  ;;  %v478_v22 = vrot.slane %v370_v49, %v1282_v45  ;;  %v474_v26 = vrot.slane %v370_v49, %v1279_v39 }
  0x6d   : > { %v388_v59 = vcombine.high %v384_v53, %v384_v53  ;;  %v494_v3 = vrot.slane %v386_v54, %v1282_v45  ;;  %v490_v5 = vrot.slane %v386_v54, %v1279_v39  ;;  %v486_v0 = vrot.slane %v384_v53, %v1282_v45 }
  0x6e   : > { %v482_v17 = vrot.slane %v384_v53, %v1279_v39  ;;  %v387_v23 = vcombine.high %v377_v14, %v377_v14  ;;  %v390_v24 = vcombine.high %v1309_v12, %v1314_v15  ;;  %v618_v29 = vmul.f32 %v478_v22, %v1294_v58 }
  0x6f   : > { %v502_v63 = vrot.slane %v388_v59, %v1282_v45  ;;  %v498_v2 = vrot.slane %v388_v59, %v1279_v39  ;;  %v626_v13 = vmul.f32 %v494_v3, %v1294_v58  ;;  %v625_v16 = vmul.f32 %v490_v5, %v1289_v56 }
  0x70   : > { %v624_v18 = vmul.f32 %v494_v3, %v1292_v57  ;;  %v623_v19 = vmul.f32 %v490_v5, %v1297_v60  ;;  %v622_v21 = vmul.f32 %v486_v0, %v1294_v58  ;;  %v621_v25 = vmul.f32 %v482_v17, %v1289_v56 }
  0x71   : > { %v630_v8 = vmul.f32 %v502_v63, %v1294_v58  ;;  %v629_v9 = vmul.f32 %v498_v2, %v1289_v56  ;;  %v628_v10 = vmul.f32 %v502_v63, %v1292_v57  ;;  %v627_v11 = vmul.f32 %v498_v2, %v1297_v60 }
  0x72   : > { %v620_v27 = vmul.f32 %v486_v0, %v1292_v57  ;;  %v619_v28 = vmul.f32 %v482_v17, %v1297_v60  ;;  %v470_v30 = vrot.slane %v387_v23, %v1282_v45  ;;  %v385_v31 = vcombine.high %v363_v20, %v363_v20 }
  0x73   : > { %667 = vmatprep.subr.mxu0 %v630_v8  ;;  %v404_v32 = vrot.slane %v390_v24, %v1277_v35  ;;  %v617_v33 = vmul.f32 %v474_v26, %v1289_v56  ;;  %v466_v34 = vrot.slane %v387_v23, %v1279_v39  ;;  %v616_v36 = vmul.f32 %v478_v22, %v1292_v57 }
  0x74   : > { %668 = vmatpush1.msra.mxu0 %v629_v9  ;;  %v615_v37 = vmul.f32 %v474_v26, %v1297_v60  ;;  %v614_v38 = vmul.f32 %v470_v30, %v1294_v58  ;;  %v462_v40 = vrot.slane %v385_v31, %v1282_v45  ;;  %v458_v43 = vrot.slane %v385_v31, %v1279_v39 }
  0x75   : > { %669 = vmatprep.subr.mxu0 %v628_v10  ;;  %v406_v41 = vcombine.high %v404_v32, %v404_v32  ;;  %v613_v42 = vmul.f32 %v466_v34, %v1289_v56  ;;  %v612_v44 = vmul.f32 %v470_v30, %v1292_v57  ;;  %v611_v46 = vmul.f32 %v466_v34, %v1297_v60 }
  0x76   : > { %670 = vmatpush1.msra.mxu0 %v627_v11  ;;  %v610_v47 = vmul.f32 %v462_v40, %v1294_v58  ;;  %v454_v48 = vrot.slane %v377_v14, %v1282_v45  ;;  %v609_v50 = vmul.f32 %v458_v43, %v1289_v56  ;;  %v450_v51 = vrot.slane %v377_v14, %v1279_v39 }
  0x77   : > { %671 = vmatprep.subr.mxu0 %v626_v13  ;;  %v434_v49 = vrot.slane %v406_v41, %v1277_v35  ;;  %v608_v52 = vmul.f32 %v462_v40, %v1292_v57  ;;  %v607_v53 = vmul.f32 %v458_v43, %v1297_v60  ;;  %v389_v54 = vcombine.low %v1309_v12, %v1314_v15 }
  0x78   : > { %672 = vmatpush1.msra.mxu0 %v625_v16  ;;  %v606_v55 = vmul.f32 %v454_v48, %v1294_v58  ;;  %v446_v59 = vrot.slane %v363_v20, %v1282_v45  ;;  %v420_v62 = vrot.slane %v404_v32, %v1277_v35  ;;  %v605_v63 = vmul.f32 %v450_v51, %v1289_v56 }
  0x79   : > { %673 = vmatprep.subr.mxu0 %v624_v18  ;;  %v438_v61 = vcombine.high %v434_v49, %v434_v49  ;;  %v442_v2 = vrot.slane %v363_v20, %v1279_v39  ;;  %v604_v3 = vmul.f32 %v454_v48, %v1292_v57  ;;  %v603_v4 = vmul.f32 %v450_v51, %v1297_v60 }
  0x7a   : > { %674 = vmatpush1.msra.mxu0 %v623_v19  ;;  %v602_v5 = vmul.f32 %v446_v59, %v1294_v58  ;;  %v436_v7 = vcombine.high %v420_v62, %v420_v62  ;;  %v397_v8 = vrot.slane %v389_v54, %v1277_v35  ;;  %v600_v11 = vmul.f32 %v446_v59, %v1292_v57 }
  0x7b   : > { %675 = vmatprep.subr.mxu0 %v622_v21  ;;  %v566_v6 = vrot.slane %v438_v61, %v1282_v45  ;;  %v601_v9 = vmul.f32 %v442_v2, %v1289_v56  ;;  %v562_v10 = vrot.slane %v438_v61, %v1279_v39  ;;  %v599_v12 = vmul.f32 %v442_v2, %v1297_v60 }
  0x7c   : > { %676 = vmatpush1.msra.mxu0 %v621_v25  ;;  %v558_v0 = vrot.slane %v436_v7, %v1282_v45  ;;  %v405_v14 = vcombine.high %v397_v8, %v397_v8  ;;  %v554_v16 = vrot.slane %v436_v7, %v1279_v39  ;;  %v550_v20 = vrot.slane %v434_v49, %v1282_v45 }
  0x7d   : > { %677 = vmatprep.subr.mxu0 %v620_v27  ;;  %v662_v13 = vmul.f32 %v566_v6, %v1294_v58  ;;  %v661_v15 = vmul.f32 %v562_v10, %v1289_v56  ;;  %v660_v17 = vmul.f32 %v566_v6, %v1292_v57  ;;  %v659_v18 = vmul.f32 %v562_v10, %v1297_v60 }
  0x7e   : > { %678 = vmatpush1.msra.mxu0 %v619_v28  ;;  %v658_v19 = vmul.f32 %v558_v0, %v1294_v58  ;;  %v427_v21 = vrot.slane %v405_v14, %v1277_v35  ;;  %v657_v22 = vmul.f32 %v554_v16, %v1289_v56  ;;  %v546_v23 = vrot.slane %v434_v49, %v1279_v39 }
  0x7f   : > { %679 = vmatprep.subr.mxu0 %v618_v29  ;;  %v656_v24 = vmul.f32 %v558_v0, %v1292_v57  ;;  %v655_v25 = vmul.f32 %v554_v16, %v1297_v60  ;;  %v654_v26 = vmul.f32 %v550_v20, %v1294_v58  ;;  %v542_v27 = vrot.slane %v420_v62, %v1282_v45 }
  0x80   : > { %680 = vmatpush1.msra.mxu0 %v617_v33  ;;  %v437_v28 = vcombine.high %v427_v21, %v427_v21  ;;  %v413_v29 = vrot.slane %v397_v8, %v1277_v35  ;;  %v653_v30 = vmul.f32 %v546_v23, %v1289_v56  ;;  %v538_v31 = vrot.slane %v420_v62, %v1279_v39 }
  0x81   : > { %681 = vmatprep.subr.mxu0 %v616_v36  ;;  %v652_v32 = vmul.f32 %v550_v20, %v1292_v57  ;;  %v651_v33 = vmul.f32 %v546_v23, %v1297_v60  ;;  %v650_v34 = vmul.f32 %v542_v27, %v1294_v58  ;;  %v648_v40 = vmul.f32 %v542_v27, %v1292_v57 }
  0x82   : > { %682 = vmatpush1.msra.mxu0 %v615_v37  ;;  %v534_v36 = vrot.slane %v437_v28, %v1282_v45  ;;  %v435_v37 = vcombine.high %v413_v29, %v413_v29  ;;  %v649_v35 = vmul.f32 %v538_v31, %v1289_v56  ;;  %v647_v41 = vmul.f32 %v538_v31, %v1297_v60 }
  0x83   : > { %683 = vmatprep.subr.mxu0 %v614_v38  ;;  %v530_v38 = vrot.slane %v437_v28, %v1279_v39  ;;  %v510_v59 = vrot.slane %v413_v29, %v1282_v45  ;;  %v506_v62 = vrot.slane %v413_v29, %v1279_v39 }
  0x84   : > { %684 = vmatpush1.msra.mxu0 %v613_v42  ;;  %v646_v42 = vmul.f32 %v534_v36, %v1294_v58  ;;  %v526_v43 = vrot.slane %v435_v37, %v1282_v45 }
  0x85   : > { %685 = vmatprep.subr.mxu0 %v612_v44  ;;  %v645_v44 = vmul.f32 %v530_v38, %v1289_v56  ;;  %v643_v48 = vmul.f32 %v530_v38, %v1297_v60 }
  0x86   : > { %686 = vmatpush1.msra.mxu0 %v611_v46  ;;  %v522_v46 = vrot.slane %v435_v37, %v1279_v39  ;;  %v642_v49 = vmul.f32 %v526_v43, %v1294_v58 }
  0x87   : > { %687 = vmatprep.subr.mxu0 %v610_v47  ;;  %v644_v47 = vmul.f32 %v534_v36, %v1292_v57 }
  0x88   : > { %688 = vmatpush1.msra.mxu0 %v609_v50  ;;  %v518_v50 = vrot.slane %v427_v21, %v1282_v45  ;;  %v641_v51 = vmul.f32 %v522_v46, %v1289_v56  ;;  %v639_v54 = vmul.f32 %v522_v46, %v1297_v60  ;;  %v632_v45 = vmul.f32 %v510_v59, %v1292_v57 }
  0x89   : > { %689 = vmatprep.subr.mxu0 %v608_v52  ;;  %v514_v52 = vrot.slane %v427_v21, %v1279_v39  ;;  %v631_v39 = vmul.f32 %v506_v62, %v1297_v60 }
  0x8a   : > { %690 = vmatpush1.msra.mxu0 %v607_v53  ;;  %v640_v53 = vmul.f32 %v526_v43, %v1292_v57 }
  0x8b   : > { %691 = vmatprep.subr.mxu0 %v606_v55  ;;  %v638_v55 = vmul.f32 %v518_v50, %v1294_v58  ;;  %v637_v61 = vmul.f32 %v514_v52, %v1289_v56  ;;  %v635_v2 = vmul.f32 %v514_v52, %v1297_v60 }
  0x8c   : > { %692 = vmatpush1.msra.mxu0 %v605_v63  ;;  %v636_v63 = vmul.f32 %v518_v50, %v1292_v57 }
  0x8d   : > { %693 = vmatprep.subr.mxu0 %v604_v3  ;;  %v634_v3 = vmul.f32 %v510_v59, %v1294_v58 }
  0x8e   : > { %694 = vmatpush1.msra.mxu0 %v603_v4  ;;  %v633_v4 = vmul.f32 %v506_v62, %v1289_v56 }
  0x8f   : > { %695 = vmatprep.subr.mxu0 %v602_v5 }
  0x90   : > { %696 = vmatpush1.msra.mxu0 %v601_v9 }
  0x91   : > { %697 = vmatprep.subr.mxu0 %v600_v11 }
  0x92   : > { %698 = vmatpush1.msra.mxu0 %v599_v12 }
  0x93   : > { %699 = vmatprep.subr.mxu0 %v662_v13 }
  0x94   : > { %700 = vmatpush2.msra.mxu0 %v661_v15 }
  0x95   : > { %701 = vmatprep.subr.mxu0 %v660_v17 }
  0x96   : > { %702 = vmatpush2.msra.mxu0 %v659_v18 }
  0x97   : > { %703 = vmatprep.subr.mxu0 %v658_v19 }
  0x98   : > { %704 = vmatpush2.msra.mxu0 %v657_v22 }
  0x99   : > { %705 = vmatprep.subr.mxu0 %v656_v24 }
  0x9a   : > { %706 = vmatpush2.msra.mxu0 %v655_v25 }
  0x9b   : > { %707 = vmatprep.subr.mxu0 %v654_v26 }
  0x9c   : > { %708 = vmatpush2.msra.mxu0 %v653_v30 }
  0x9d   : > { %709 = vmatprep.subr.mxu0 %v652_v32 }
  0x9e   : > { %710 = vmatpush2.msra.mxu0 %v651_v33 }
  0x9f   : > { %711 = vmatprep.subr.mxu0 %v650_v34 }
  0xa0   : > { %712 = vmatpush2.msra.mxu0 %v649_v35 }
  0xa1   : > { %713 = vmatprep.subr.mxu0 %v648_v40 }
  0xa2   : > { %714 = vmatpush2.msra.mxu0 %v647_v41 }
  0xa3   : > { %715 = vmatprep.subr.mxu0 %v646_v42 }
  0xa4   : > { %716 = vmatpush2.msra.mxu0 %v645_v44 }
  0xa5   : > { %717 = vmatprep.subr.mxu0 %v644_v47 }
  0xa6   : > { %718 = vmatpush2.msra.mxu0 %v643_v48 }
  0xa7   : > { %719 = vmatprep.subr.mxu0 %v642_v49 }
  0xa8   : > { %720 = vmatpush2.msra.mxu0 %v641_v51 }
  0xa9   : > { %721 = vmatprep.subr.mxu0 %v640_v53 }
  0xaa   : > { %722 = vmatpush2.msra.mxu0 %v639_v54 }
  0xab   : > { %723 = vmatprep.subr.mxu0 %v638_v55 }
  0xac   : > { %724 = vmatpush2.msra.mxu0 %v637_v61 }
  0xad   : > { %725 = vmatprep.subr.mxu0 %v636_v63 }
  0xae   : > { %726 = vmatpush2.msra.mxu0 %v635_v2 }
  0xaf   : > { %727 = vmatprep.subr.mxu0 %v634_v3 }
  0xb0   : > { %728 = vmatpush2.msra.mxu0 %v633_v4 }
  0xb1   : > { %729 = vmatprep.subr.mxu0 %v632_v45 }
  0xb2   : > { %730 = vmatpush2.msra.mxu0 %v631_v39 }
  0xb3   : > { %732 = vmatmul.mubr.f32.vlgmr.msra.gmra.mxu0 %v1220_v1 }
 0x173   : > { %v733_v5 = vpop.f32.mrf.mxu0 }
 0x175   : > { %v735_v56 = vpop.f32.mrf.mxu0 }
 0x176   : > { %v740_v58 = vcombine.low %v733_v5, %v735_v56 }
 0x178   : > { %742 = vst [vmem:[%s185_s29] sm:$0xff] %v740_v58 }
 0x179   : > { %1007 = shalt.err (!%p1004_p7)
}
 0x17a   : > { %s1008_s30 = scalar_lea.hbm %s758_s19, 128  ;;  %s1012_s16 = scalar_lea.hbm %s1458_s2, 256 }
 0x17b   : > { %p1009_p2 = scmp.ne.s32.totalorder %s758_s19, %s1008_s30  ;;  %p1013_p13 = scmp.lt.s32.totalorder %s758_s19, %s1458_s2 }
 0x17c   : > { %p1014_p0 = scmp.lt.s32.totalorder %s1012_s16, %s1008_s30 }
 0x17d   : > { %p1010_p11 = pnand %p1009_p2, %p1468_p4 }
 0x17e   : > { %p1015_p10 = por %p1014_p0, %p1013_p13 }
 0x17f   : > { %p1011_p12 = pneg %p1010_p11 }
 0x181   : > { %p1016_p1 = pnand %p1015_p10, %p1011_p12 }
 0x183   : > { %1019 = shalt.err (!%p1016_p1)
}
 0x184   : > { %886 = dma.vmem_to_hbm [thread:$0]  (%p1468_p4), %s761_s3, 128, %s758_s19, %s744_s21  }
 0x185 PF: > { %s772_s25 = sand.u32 1, %s1058_s9   ;;  %p1469_p6 = scmp.ne.s32.totalorder %s1463_s20, 0 }
 0x186   : > { %p1470_p8 = scmp.ge.s32.totalorder %s1078_s14, 2  ;;  %s773_s23 = scalar_lea.sflag [#allocation4], %s772_s25 }
 0x188   : > { %p897_p9 = pnand %p1470_p8, %p1469_p6 }
 0x18a   : > { %p898_p3 = pneg %p897_p9 }
 0x18c   : > { %1053 = dma.done.wait (%p898_p3), %s773_s23, 128  }
 0x18d   : > { %1055 = vsyncadd (%p898_p3), %s773_s23, 4294967168  ;;  %s19_s14 = sadd.s32 1, %s1078_s14   ;;  %s1471_s9 = smov %s1062_s10 }
 0x18e   : > { %p16_p5 = scmp.ge.s32.totalorder %s19_s14, 4   ;;  %s1472_s10 = smov %s1066_s11 }
 0x18f   : > { %s1473_s11 = smov %s1187_s4  ;;  %s1474_s12 = smov %s1074_s13 }
 0x190   : > { %s1475_s13 = smov %s1477_s22  ;;  %18 = sbr.rel (!%p16_p5) target bundleno = 7 (0x7), region = 78 }
 0x195   :  { %778 = vsyncpa [#allocation3], 1 }
 0x196   :  { %780 = vsyncpa [#allocation3 + $0x1], 1 }
 0x197   :  { %781 = vsyncpa [#allocation4], 1 }
 0x198   :  { %783 = vsyncpa [#allocation4 + $0x1], 1 }
 0x199   :  { %784 = vsyncpa [#allocation5], 1 }
 0x19a   :  { %786 = vsyncpa [#allocation5 + $0x1], 1 }

</bundles_post_ra>
